<compile_context>
chip_gen: v5e
topology: v5e:2x2
jax: 0.10.0
libtpu: 0.0.40
codegen_flags: <defaults>
</compile_context>

<pallas_src>
import functools
import math

import jax
import jax.numpy as jnp
from jax.experimental import pallas as pl
from jax.experimental.pallas import tpu as pltpu

_INV_SQRT_2PI = 1.0 / math.sqrt(2.0 * math.pi)


def _gaussian_like_kernel(x_ref, mean_ref, std_ref, o_ref):
    # Blocks:
    #   x_ref, o_ref     : (row_tile, col_tile)
    #   mean_ref/std_ref : (1, col_tile), broadcast over rows by jnp.
    x = x_ref[...].astype(jnp.float32)
    mean = mean_ref[...].astype(jnp.float32)
    std = std_ref[...].astype(jnp.float32)

    # Reciprocal on the (1, col_tile) row only -> EUP slot, near-free.
    inv_std = pl.reciprocal(std, approx=True)
    c = (-0.5) * (inv_std * inv_std)          # per-column exponent coefficient
    s = inv_std * _INV_SQRT_2PI               # per-column output scale

    d = x - mean
    out = jnp.exp((d * d) * c) * s
    o_ref[...] = out.astype(o_ref.dtype)


def _sublane_for_dtype(dtype) -> int:
    itemsize = jnp.dtype(dtype).itemsize
    if itemsize >= 4:
        return 8
    if itemsize == 2:
        return 16
    return 32


@functools.partial(jax.jit, static_argnames=("vmem_budget_bytes",))
def gaussian_like(x: jax.Array, mean: jax.Array, std: jax.Array,
                  *, vmem_budget_bytes: int = 8 * 1024 * 1024) -> jax.Array:
    """Pallas equivalent of GaussianLike(width).forward(x) for 2-D x."""
    batch, width = x.shape
    assert mean.shape == (1, width), mean.shape
    assert std.shape == (1, width), std.shape

    dtype_bytes = jnp.dtype(x.dtype).itemsize
    sublane = _sublane_for_dtype(x.dtype)

    # ---- width (lane) tiling: keep FULL width whenever even a minimal
    # sublane-high, double-buffered (in + out) block fits the budget; only
    # fall back to lane-dense column tiles for extreme widths.
    min_full_width_block_bytes = 4 * sublane * width * dtype_bytes
    if min_full_width_block_bytes <= vmem_budget_bytes:
        col_tile = width                      # full dim -> one contiguous DMA/block
    else:
        col_tile = 2048                       # multiple of 128 -> lane-dense
    # TODO(synk): for widths not a multiple of 128 under column tiling, the
    # output tail uses masked stores; padding in the wrapper would avoid it.

    # ---- row (sublane) tiling: size each block so the double-buffered
    # (in + out) footprint fills the budget (~budget/4 bytes per block,
    # i.e. ~2 MiB at the default budget).
    per_block_budget = max(vmem_budget_bytes // 4, 1)
    max_rows = max(sublane, per_block_budget // max(col_tile * dtype_bytes, 1))
    row_tile = max(sublane, (int(max_rows) // sublane) * sublane)
    # Do not pick a tile larger than the (sublane-rounded) batch itself.
    batch_rounded = max(sublane, pl.cdiv(batch, sublane) * sublane)
    row_tile = min(row_tile, batch_rounded)

    # Grid ordered (cols, rows): row axis is fastest-varying, so the
    # (1, col_tile) mean/std block index is constant along the fast axis.
    grid = (pl.cdiv(width, col_tile), pl.cdiv(batch, row_tile))

    cost = pl.CostEstimate(
        flops=5 * batch * width,
        transcendentals=batch * width,
        bytes_accessed=(2 * batch * width + 2 * width) * dtype_bytes,
    )

    return pl.pallas_call(
        _gaussian_like_kernel,
        out_shape=jax.ShapeDtypeStruct((batch, width), x.dtype),
        grid_spec=pltpu.PrefetchScalarGridSpec(
            num_scalar_prefetch=0,
            grid=grid,
            in_specs=[
                pl.BlockSpec((row_tile, col_tile), lambda j, i: (i, j)),
                pl.BlockSpec((1, col_tile), lambda j, i: (0, j)),
                pl.BlockSpec((1, col_tile), lambda j, i: (0, j)),
            ],
            out_specs=pl.BlockSpec((row_tile, col_tile), lambda j, i: (i, j)),
        ),
        compiler_params=pltpu.CompilerParams(
            dimension_semantics=("parallel", "parallel"),
            vmem_limit_bytes=min(vmem_budget_bytes + (8 << 20), 64 << 20),
        ),
        cost_estimate=cost,
    )(x, mean, std)


if __name__ == "__main__":
    key = jax.random.PRNGKey(0)
    k_x, k_mean, k_std = jax.random.split(key, 3)

    batch, width = 16, 128   # small, lane-dense demo shape
    x = jax.random.normal(k_x, (batch, width), dtype=jnp.float32)
    mean = jax.random.normal(k_mean, (1, width), dtype=jnp.float32)
    # Module init is randn; keep that (values near 0 only affect tolerance).
    std = jax.random.normal(k_std, (1, width), dtype=jnp.float32)

    out = gaussian_like(x, mean, std)
    out = jax.block_until_ready(out)

    # Pure-JAX reference (identical formula to the PyTorch forward).
    ref = jnp.exp(-0.5 * ((x - mean) / std) ** 2) / (std * jnp.sqrt(2.0 * jnp.pi))

    assert out.shape == (batch, width), out.shape
    assert out.dtype == x.dtype, out.dtype
    # Tolerance loosened slightly because the kernel uses the approximate
    # (EUP) reciprocal, whose error enters the exponent.
    assert jnp.allclose(out, ref, rtol=2e-2, atol=2e-4), "mismatch vs reference"

    print("KERNEL_OK")
</pallas_src>

<mosaic_0001>
module attributes {stable_mosaic.version = 11 : i64} {
  func.func @_gaussian_like_kernel(%arg0: i32, %arg1: i32, %arg2: memref<16x128xf32, #tpu.memory_space<vmem>>, %arg3: memref<1x128xf32, #tpu.memory_space<vmem>>, %arg4: memref<1x128xf32, #tpu.memory_space<vmem>>, %arg5: memref<16x128xf32, #tpu.memory_space<vmem>>) attributes {dimension_semantics = [#tpu.dimension_semantics<parallel>, #tpu.dimension_semantics<parallel>], iteration_bounds = array<i64: 1, 1>, scalar_prefetch = 0 : i64, scratch_operands = 0 : i64, tpu.core_type = #tpu.core_type<tc>, window_params = [{transform_indices = @transform_0, window_bounds = array<i64: 16, 128>}, {transform_indices = @transform_1, window_bounds = array<i64: 1, 128>}, {transform_indices = @transform_2, window_bounds = array<i64: 1, 128>}, {transform_indices = @transform_3, window_bounds = array<i64: 16, 128>}]} {
    %c0 = arith.constant 0 : index
    %c0_0 = arith.constant 0 : index
    %0 = vector.load %arg2[%c0, %c0_0] : memref<16x128xf32, #tpu.memory_space<vmem>>, vector<16x128xf32>
    %c0_1 = arith.constant 0 : index
    %c0_2 = arith.constant 0 : index
    %1 = vector.load %arg3[%c0_1, %c0_2] : memref<1x128xf32, #tpu.memory_space<vmem>>, vector<1x128xf32>
    %c0_3 = arith.constant 0 : index
    %c0_4 = arith.constant 0 : index
    %2 = vector.load %arg4[%c0_3, %c0_4] : memref<1x128xf32, #tpu.memory_space<vmem>>, vector<1x128xf32>
    %3 = tpu.reciprocal %2 {approx = true} : vector<1x128xf32> -> vector<1x128xf32>
    %4 = arith.mulf %3, %3 : vector<1x128xf32>
    %cst = arith.constant -5.000000e-01 : f32
    %5 = vector.broadcast %cst : f32 to vector<1x128xf32>
    %6 = arith.mulf %5, %4 : vector<1x128xf32>
    %cst_5 = arith.constant 0.398942292 : f32
    %7 = vector.broadcast %cst_5 : f32 to vector<1x128xf32>
    %8 = arith.mulf %3, %7 : vector<1x128xf32>
    %9 = vector.broadcast %1 : vector<1x128xf32> to vector<16x128xf32>
    %10 = arith.subf %0, %9 : vector<16x128xf32>
    %11 = arith.mulf %10, %10 : vector<16x128xf32>
    %12 = vector.broadcast %6 : vector<1x128xf32> to vector<16x128xf32>
    %13 = arith.mulf %11, %12 : vector<16x128xf32>
    %14 = math.exp %13 : vector<16x128xf32>
    %15 = vector.broadcast %8 : vector<1x128xf32> to vector<16x128xf32>
    %16 = arith.mulf %14, %15 : vector<16x128xf32>
    %c0_6 = arith.constant 0 : index
    %c0_7 = arith.constant 0 : index
    %17 = vector.load %arg5[%c0_6, %c0_7] : memref<16x128xf32, #tpu.memory_space<vmem>>, vector<16x128xf32>
    tpu.vector_store %arg5[%c0_6, %c0_7], %16 {strides = array<i32>} : memref<16x128xf32, #tpu.memory_space<vmem>>, vector<16x128xf32>,
    return
  }
  func.func @transform_0(%arg0: i32, %arg1: i32) -> (i32, i32) {
    %c0_i32 = arith.constant 0 : i32
    return %arg1, %arg0 : i32, i32
  }
  func.func @transform_1(%arg0: i32, %arg1: i32) -> (i32, i32) {
    %c0_i32 = arith.constant 0 : i32
    %c0_i32_0 = arith.constant 0 : i32
    return %c0_i32, %arg0 : i32, i32
  }
  func.func @transform_2(%arg0: i32, %arg1: i32) -> (i32, i32) {
    %c0_i32 = arith.constant 0 : i32
    %c0_i32_0 = arith.constant 0 : i32
    return %c0_i32, %arg0 : i32, i32
  }
  func.func @transform_3(%arg0: i32, %arg1: i32) -> (i32, i32) {
    %c0_i32 = arith.constant 0 : i32
    return %arg1, %arg0 : i32, i32
  }
}

</mosaic_0001>

<bundles_post_ra>
// kernel: gaussian_like.1
= control target key start
LH: loop header
LB: loop body
LE: loop exit
PB: predicated region body
PF: predicated region fallthrough
CT: control target
= control target key end

     0   :  { %8 = vsyncpa [#allocation3], 0  ;;  %s229_s0 = inlined_call_operand.hbm [shape: f32[16,128], index: 0, kind: input, shape index: {}]   ;;  %s230_s1 = inlined_call_operand.hbm [shape: f32[1,128], index: 1, kind: input, shape index: {}]   ;;  %s231_s2 = inlined_call_operand.vmem [shape: f32[1,128], index: 2, kind: input, shape index: {}]   ;;  %s232_s3 = inlined_call_operand.hbm [shape: f32[16,128], index: 3, kind: output, shape index: {}]  }
   0x1   :  { %9 = vsyncpa [#allocation6], 0 }
   0x2   :  { %10 = vsyncpa [#allocation4], 0  ;;  %s15_s14 = sshll.u32 %s229_s0, 4  ;;  %s186_s15 = smov [#allocation2]   ;;  %s16_s14 = int_to_ptr.hbm [resolvable:$true] %s15_s14 }
   0x3   :  { %s17_s16 = sshll.u32 %s186_s15, 4  ;;  %s29_s19 = sshll.u32 %s230_s1, 4  ;;  %s18_s16 = int_to_ptr.vmem [resolvable:$true] %s17_s16  ;;  %s30_s19 = int_to_ptr.hbm [resolvable:$true] %s29_s19 }
   0x4   :  { %s187_s20 = smov 128   ;;  %s188_s21 = smov 8  }
   0x5   :  { %23 = dma.hbm_to_vmem [thread:$0]  %s16_s14, 256, %s18_s16, [#allocation3], %s187_s20, %s187_s20, %s188_s21  }
   0x6   :  { %s189_s22 = smov [#allocation5]  }
   0x7   :  { %s31_s23 = sshll.u32 %s189_s22, 4  ;;  %s32_s23 = int_to_ptr.vmem [resolvable:$true] %s31_s23 }
   0x8   :  { %34 = dma.hbm_to_vmem [thread:$0]  %s30_s19, 16, %s32_s23, [#allocation6]  }
   0x9   :  { %180 = dma.done.wait [#allocation3], 256  }
   0xa   :  { %181 = vsyncadd [#allocation3], 4294967040 }
   0xb   :  { %182 = dma.done.wait [#allocation6], 16  }
   0xc   :  { %183 = vsyncadd [#allocation6], 4294967280  ;;  %v48_v0 = vld [vmem:[%s231_s2] sm:$0x1]  ;;  %v101_v1 = vld [vmem:[#allocation5] ss:$0 sm:$0xff] }
   0xd   :  { %102 = vrcp.f32 %v48_v0  ;;  %v45_v2 = vld [vmem:[#allocation2] sm:$0xff]  ;;  %v46_v3 = vld [vmem:[#allocation2 + $0x8] sm:$0xff]  ;;  %s190_s1 = smov [#allocation7]   ;;  %s82_s27 = sshll.u32 %s232_s3, 4  ;;  %s83_s27 = int_to_ptr.hbm [resolvable:$true] %s82_s27 }
   0xe   :  { %v56_v4 = vsub.f32 %v45_v2, %v101_v1  ;;  %v57_v5 = vsub.f32 %v46_v3, %v101_v1  ;;  %s80_s2 = sshll.u32 %s190_s1, 4  ;;  %s81_s2 = int_to_ptr.vmem [resolvable:$true] %s80_s2 }
  0x10   :  { %v58_v9 = vmul.f32 %v56_v4, %v56_v4  ;;  %v59_v10 = vmul.f32 %v57_v5, %v57_v5 }
  0x13   :  { %v103_v6 = vpop.eup %102 }
  0x14   :  { %v50_v7 = vmul.f32 %v103_v6, %v103_v6  ;;  %v52_v16 = vmul.f32 0.3989423, %v103_v6 }
  0x16   :  { %v51_v8 = vmul.f32 -0.5, %v50_v7  ;;  %v70_v17 = vperm.slane %v52_v16, 0 }
  0x18   :  { %v61_v11 = vperm.slane %v51_v8, 0 }
  0x1a   :  { %v63_v12 = vmul.f32 %v61_v11, %v58_v9  ;;  %v64_v13 = vmul.f32 %v61_v11, %v59_v10 }
  0x1c   :  { %v65_v14 = vmul.f32 1.442695, %v63_v12  ;;  %v67_v15 = vmul.f32 1.442695, %v64_v13 }
  0x1e   :  { %104 = vpow2.f32 %v65_v14 }
  0x1f   :  { %106 = vpow2.f32 %v67_v15 }
  0x24   :  { %v105_v18 = vpop.eup %104 }
  0x25   :  { %v107_v19 = vpop.eup %106  ;;  %v72_v20 = vmul.f32 %v105_v18, %v70_v17 }
  0x26   :  { %v73_v21 = vmul.f32 %v107_v19, %v70_v17 }
  0x27   :  { %74 = vst [vmem:[#allocation7] sm:$0xff] %v72_v20 }
  0x28   :  { %75 = vst [vmem:[#allocation7 + $0x8] sm:$0xff] %v73_v21 }
  0x29   :  { %88 = dma.vmem_to_hbm [thread:$0]  %s81_s2, 256, %s83_s27, [#allocation4], %s187_s20, %s187_s20, %s188_s21  }
  0x2a   :  { %184 = dma.done.wait [#allocation4], 256  }
  0x2b   :  { %185 = vsyncadd [#allocation4], 4294967040 }
  0x2c   :  { %93 = vsyncpa [#allocation3], 1 }
  0x2d   :  { %94 = vsyncpa [#allocation6], 1 }
  0x2e   :  { %95 = vsyncpa [#allocation4], 1 }

</bundles_post_ra>
